<compile_context>
chip_gen: v7x
topology: tpu7x:2x2x1
jax: 0.10.0
libtpu: 0.0.40
codegen_flags: <defaults>
</compile_context>

<pallas_src>
import jax
import jax.numpy as jnp
from jax.experimental import pallas as pl
from jax.experimental.pallas import tpu as pltpu

INPUT = 8
HIDDEN = 16
ACTIONS = 6
NCELLS = 3
GATES = 4 * HIDDEN                    # 64 gate lanes per cell
HEAD_COLS = NCELLS * ACTIONS + 1      # 19 = a1|a2|a3|v
PACK = HEAD_COLS + 2 * HIDDEN         # 51 useful output lanes per step
OUT_WIDTH = 128                       # lane-dense packed output row

# Parameter slab layout, f32, shape (80, 192):
#   rows  0:8    W_ih fused  (8,192)   cell c -> cols 64c:64c+64, gate order [i,f,o,g]
#   rows  8:24   W_hh fused  (16,192)  same column layout
#   row   24     lstm bias   (1,192)   b_ih + b_hh per cell
#   row   25     head bias   (1,19)    in cols 0:19
#   rows 32:80   head weight (48,19)   in cols 0:19  (block matrix, critic/3)
SLAB_ROWS = 80
SLAB_COLS = NCELLS * GATES            # 192


def rl_agent_rollout_kernel(x_ref, hc0_ref, p_ref, out_ref, hc_ref, hcat_ref):
    t = pl.program_id(0)

    # Initialize the VMEM-resident recurrent state on the first grid step.
    @pl.when(t == 0)
    def _():
        hc_ref[...] = hc0_ref[...]

    x = x_ref[0]                                    # (1, 8)
    h = hc_ref[:, 0:HIDDEN]                         # (1, 16)
    c = hc_ref[:, HIDDEN:2 * HIDDEN]                # (1, 16)

    w_ih = p_ref[0:INPUT, :]                        # (8, 192)
    w_hh = p_ref[INPUT:INPUT + HIDDEN, :]           # (16, 192)
    bias = p_ref[24:25, :]                          # (1, 192)

    # Off-chain: input contribution + bias for all 3 cells in one MXU pass.
    xb = jnp.dot(x, w_ih, preferred_element_type=jnp.float32) + bias    # (1, 192)

    for cell in range(NCELLS):
        lo = cell * GATES
        gates = xb[:, lo:lo + GATES] + jnp.dot(
            h, w_hh[:, lo:lo + GATES],
            preferred_element_type=jnp.float32)                         # (1, 64)
        # Gate order is [i, f, o, g] (host-side reorder) -> one contiguous
        # sigmoid over 48 lanes, one tanh over 16 lanes.
        sig = jax.nn.sigmoid(gates[:, 0:3 * HIDDEN])
        g_g = jnp.tanh(gates[:, 3 * HIDDEN:4 * HIDDEN])
        i_g = sig[:, 0:HIDDEN]
        f_g = sig[:, HIDDEN:2 * HIDDEN]
        o_g = sig[:, 2 * HIDDEN:3 * HIDDEN]
        c = f_g * c + i_g * g_g
        h = o_g * jnp.tanh(c)
        hcat_ref[:, cell * HIDDEN:(cell + 1) * HIDDEN] = h

    # One lane-contiguous head matmul: (1,48) @ (48,19) -> [a1|a2|a3|v].
    head_w = p_ref[32:32 + NCELLS * HIDDEN, 0:HEAD_COLS]                 # (48, 19)
    head_b = p_ref[25:26, 0:HEAD_COLS]                                   # (1, 19)
    heads = jnp.dot(hcat_ref[...], head_w,
                    preferred_element_type=jnp.float32) + head_b         # (1, 19)

    # Carry recurrent state to the next grid step.
    hc_ref[:, 0:HIDDEN] = h
    hc_ref[:, HIDDEN:2 * HIDDEN] = c

    # Single lane-dense 128-wide store per step.
    out_ref[0] = jnp.concatenate(
        [heads, h, c, jnp.zeros((1, OUT_WIDTH - PACK), jnp.float32)], axis=-1)


def rl_agent_rollout(states, h0, c0, param_slab):
    """Run T chained forward() steps; returns (a1, a2, a3, v, h3, c3), each (T, ...)."""
    T = states.shape[0]
    states3 = states.reshape(T, 1, INPUT)
    hc0 = jnp.concatenate([h0, c0], axis=-1)                             # (1, 32)

    packed = pl.pallas_call(
        rl_agent_rollout_kernel,
        out_shape=jax.ShapeDtypeStruct((T, 1, OUT_WIDTH), jnp.float32),
        grid_spec=pltpu.PrefetchScalarGridSpec(
            num_scalar_prefetch=0,
            grid=(T,),
            in_specs=[
                pl.BlockSpec((1, 1, INPUT), lambda t: (t, 0, 0)),        # per-step state
                pl.BlockSpec((1, 2 * HIDDEN), lambda t: (0, 0)),         # resident hc0
                pl.BlockSpec((SLAB_ROWS, SLAB_COLS), lambda t: (0, 0)),  # resident params
            ],
            out_specs=pl.BlockSpec((1, 1, OUT_WIDTH), lambda t: (t, 0, 0)),
            scratch_shapes=[
                pltpu.VMEM((1, 2 * HIDDEN), jnp.float32),        # carried h|c
                pltpu.VMEM((1, NCELLS * HIDDEN), jnp.float32),   # h1|h2|h3 for the head
            ],
        ),
        compiler_params=pltpu.CompilerParams(
            dimension_semantics=("arbitrary",)),   # sequential recurrence over T
    )(states3, hc0, param_slab)

    packed = packed.reshape(T, OUT_WIDTH)
    a1 = packed[:, 0:ACTIONS]
    a2 = packed[:, ACTIONS:2 * ACTIONS]
    a3 = packed[:, 2 * ACTIONS:3 * ACTIONS]
    v = packed[:, 3 * ACTIONS:HEAD_COLS]
    h3 = packed[:, HEAD_COLS:HEAD_COLS + HIDDEN]
    c3 = packed[:, HEAD_COLS + HIDDEN:PACK]
    return a1, a2, a3, v, h3, c3


def rl_agent_forward(state, h0, c0, param_slab):
    """Single-step forward with the exact RLAgent.forward(state, h0, c0) interface."""
    return rl_agent_rollout(state, h0, c0, param_slab)   # T == 1


# ---------------------------------------------------------------------------
# Host-side parameter construction / packing and a pure-JAX reference.
# ---------------------------------------------------------------------------
def make_raw_params(key):
    """Deterministic synthetic params in PyTorch layout (gate order [i,f,g,o])."""
    ks = jax.random.split(key, 16)
    scale = 1.0 / (HIDDEN ** 0.5)

    def u(k, shape):
        return jax.random.uniform(k, shape, jnp.float32, -scale, scale)

    cells = []
    for base in (0, 4, 8):
        cells.append(dict(w_ih=u(ks[base + 0], (GATES, INPUT)),
                          w_hh=u(ks[base + 1], (GATES, HIDDEN)),
                          b_ih=u(ks[base + 2], (GATES,)),
                          b_hh=u(ks[base + 3], (GATES,))))
    return dict(cells=cells,
                actor_w=u(ks[12], (ACTIONS, HIDDEN)),
                actor_b=u(ks[13], (ACTIONS,)),
                critic_w=u(ks[14], (1, HIDDEN)),
                critic_b=u(ks[15], (1,)))


def _reorder_ifog(w):
    """Columns [i|f|g|o] (blocks of HIDDEN) -> [i|f|o|g]."""
    return jnp.concatenate([w[:, 0:2 * HIDDEN],
                            w[:, 3 * HIDDEN:4 * HIDDEN],
                            w[:, 2 * HIDDEN:3 * HIDDEN]], axis=1)


def pack_params(raw):
    """Pack all parameters into one (80, 192) f32 slab (layout documented above)."""
    w_ih_cols, w_hh_cols, b_cols = [], [], []
    for cell in raw["cells"]:
        w_ih_cols.append(_reorder_ifog(cell["w_ih"].T))                       # (8, 64)
        w_hh_cols.append(_reorder_ifog(cell["w_hh"].T))                       # (16, 64)
        b_cols.append(_reorder_ifog((cell["b_ih"] + cell["b_hh"])[None, :]))  # (1, 64)

    aw_t = raw["actor_w"].T                       # (16, 6)
    cw_t = raw["critic_w"].T / 3.0                # (16, 1), pre-scaled: sum -> mean
    zeros6 = jnp.zeros((HIDDEN, ACTIONS), jnp.float32)
    head_rows = []
    for cell in range(NCELLS):
        blocks = [aw_t if j == cell else zeros6 for j in range(NCELLS)] + [cw_t]
        head_rows.append(jnp.concatenate(blocks, axis=1))                     # (16, 19)
    head_w = jnp.concatenate(head_rows, axis=0)                               # (48, 19)
    head_b = jnp.concatenate([raw["actor_b"]] * NCELLS
                             + [raw["critic_b"]])[None, :]                    # (1, 19)

    slab = jnp.zeros((SLAB_ROWS, SLAB_COLS), jnp.float32)
    slab = slab.at[0:INPUT, :].set(jnp.concatenate(w_ih_cols, axis=1))
    slab = slab.at[INPUT:INPUT + HIDDEN, :].set(jnp.concatenate(w_hh_cols, axis=1))
    slab = slab.at[24:25, :].set(jnp.concatenate(b_cols, axis=1))
    slab = slab.at[25:26, 0:HEAD_COLS].set(head_b)
    slab = slab.at[32:32 + NCELLS * HIDDEN, 0:HEAD_COLS].set(head_w)
    return slab


def _lstm_cell_ref(x, h, c, p):
    g = x @ p["w_ih"].T + p["b_ih"] + h @ p["w_hh"].T + p["b_hh"]
    i = jax.nn.sigmoid(g[:, 0:HIDDEN])
    f = jax.nn.sigmoid(g[:, HIDDEN:2 * HIDDEN])
    gg = jnp.tanh(g[:, 2 * HIDDEN:3 * HIDDEN])
    o = jax.nn.sigmoid(g[:, 3 * HIDDEN:4 * HIDDEN])
    c_n = f * c + i * gg
    return o * jnp.tanh(c_n), c_n


def reference_step(state, h0, c0, raw):
    """Pure-JAX mirror of RLAgent.forward (PyTorch semantics)."""
    aw, ab = raw["actor_w"], raw["actor_b"]
    cw, cb = raw["critic_w"], raw["critic_b"]
    h1, c1 = _lstm_cell_ref(state, h0, c0, raw["cells"][0])
    a1 = h1 @ aw.T + ab
    h2, c2 = _lstm_cell_ref(state, h1, c1, raw["cells"][1])
    a2 = h2 @ aw.T + ab
    h3, c3 = _lstm_cell_ref(state, h2, c2, raw["cells"][2])
    a3 = h3 @ aw.T + ab
    v = ((h1 @ cw.T + cb) + (h2 @ cw.T + cb) + (h3 @ cw.T + cb)) / 3.0
    return a1, a2, a3, v, h3, c3


def reference_rollout(states, h0, c0, raw):
    h, c = h0, c0
    outs = []
    for t in range(states.shape[0]):
        a1, a2, a3, v, h, c = reference_step(states[t:t + 1], h, c, raw)
        outs.append((a1, a2, a3, v, h, c))
    return tuple(jnp.concatenate(col, axis=0) for col in zip(*outs))


if __name__ == "__main__":
    key = jax.random.PRNGKey(0)
    k_state, k_h, k_c, k_params = jax.random.split(key, 4)

    T = 8                                   # small rollout length
    states = jax.random.normal(k_state, (T, INPUT), jnp.float32)
    h0 = jax.random.normal(k_h, (1, HIDDEN), jnp.float32)
    c0 = jax.random.normal(k_c, (1, HIDDEN), jnp.float32)

    raw = make_raw_params(k_params)
    slab = pack_params(raw)

    names = ("a1", "a2", "a3", "v", "h3", "c3")

    # In-kernel T-step rollout vs. pure-JAX reference.
    outs = jax.block_until_ready(rl_agent_rollout(states, h0, c0, slab))
    refs = reference_rollout(states, h0, c0, raw)
    for name, o, r in zip(names, outs, refs):
        assert o.shape == r.shape, (name, o.shape, r.shape)
        assert jnp.allclose(o, r, atol=1e-4, rtol=1e-4), (
            name, float(jnp.max(jnp.abs(o - r))))

    # Single-step path (exact RLAgent.forward interface).
    step_outs = jax.block_until_ready(rl_agent_forward(states[0:1], h0, c0, slab))
    step_refs = reference_step(states[0:1], h0, c0, raw)
    for name, o, r in zip(names, step_outs, step_refs):
        assert o.shape == r.shape, (name, o.shape, r.shape)
        assert jnp.allclose(o, r, atol=1e-4, rtol=1e-4), name

    print("KERNEL_OK")
</pallas_src>

<mosaic_0001>
module attributes {stable_mosaic.version = 11 : i64} {
  func.func @rl_agent_rollout_kernel(%arg0: i32, %arg1: memref<1x1x8xf32, #tpu.memory_space<vmem>>, %arg2: memref<1x32xf32, #tpu.memory_space<vmem>>, %arg3: memref<80x192xf32, #tpu.memory_space<vmem>>, %arg4: memref<1x1x128xf32, #tpu.memory_space<vmem>>, %arg5: memref<1x32xf32, #tpu.memory_space<vmem>>, %arg6: memref<1x48xf32, #tpu.memory_space<vmem>>) attributes {dimension_semantics = [#tpu.dimension_semantics<arbitrary>], iteration_bounds = array<i64: 8>, scalar_prefetch = 0 : i64, scratch_operands = 2 : i64, tpu.core_type = #tpu.core_type<tc>, window_params = [{transform_indices = @transform_0, window_bounds = array<i64: 1, 1, 8>}, {pipeline_mode = #tpu.pipeline_mode<synchronous>, transform_indices = @transform_1, window_bounds = array<i64: 1, 32>}, {pipeline_mode = #tpu.pipeline_mode<synchronous>, transform_indices = @transform_2, window_bounds = array<i64: 80, 192>}, {transform_indices = @transform_3, window_bounds = array<i64: 1, 1, 128>}]} {
    %c0_i32 = arith.constant 0 : i32
    %0 = arith.cmpi eq, %arg0, %c0_i32 : i32
    %1 = arith.extui %0 : i1 to i32
    %c0_i32_0 = arith.constant 0 : i32
    %2 = arith.cmpi ne, %1, %c0_i32_0 : i32
    scf.if %2 {
      %c0_35 = arith.constant 0 : index
      %c0_36 = arith.constant 0 : index
      %87 = vector.load %arg2[%c0_35, %c0_36] : memref<1x32xf32, #tpu.memory_space<vmem>>, vector<1x32xf32>
      %c0_37 = arith.constant 0 : index
      %c0_38 = arith.constant 0 : index
      %88 = vector.load %arg5[%c0_37, %c0_38] : memref<1x32xf32, #tpu.memory_space<vmem>>, vector<1x32xf32>
      tpu.vector_store %arg5[%c0_37, %c0_38], %87 {strides = array<i32>} : memref<1x32xf32, #tpu.memory_space<vmem>>, vector<1x32xf32>,
    } else {
    }
    %c0 = arith.constant 0 : index
    %c0_1 = arith.constant 0 : index
    %c0_2 = arith.constant 0 : index
    %3 = vector.load %arg1[%c0, %c0_1, %c0_2] : memref<1x1x8xf32, #tpu.memory_space<vmem>>, vector<1x1x8xf32>
    %4 = vector.shape_cast %3 : vector<1x1x8xf32> to vector<1x8xf32>
    %c0_3 = arith.constant 0 : index
    %c0_4 = arith.constant 0 : index
    %5 = vector.load %arg5[%c0_3, %c0_4] : memref<1x32xf32, #tpu.memory_space<vmem>>, vector<1x16xf32>
    %c0_5 = arith.constant 0 : index
    %c16 = arith.constant 16 : index
    %6 = vector.load %arg5[%c0_5, %c16] : memref<1x32xf32, #tpu.memory_space<vmem>>, vector<1x16xf32>
    %c0_6 = arith.constant 0 : index
    %c0_7 = arith.constant 0 : index
    %7 = vector.load %arg3[%c0_6, %c0_7] : memref<80x192xf32, #tpu.memory_space<vmem>>, vector<8x192xf32>
    %c8 = arith.constant 8 : index
    %c0_8 = arith.constant 0 : index
    %8 = vector.load %arg3[%c8, %c0_8] : memref<80x192xf32, #tpu.memory_space<vmem>>, vector<16x192xf32>
    %c24 = arith.constant 24 : index
    %c0_9 = arith.constant 0 : index
    %9 = vector.load %arg3[%c24, %c0_9] : memref<80x192xf32, #tpu.memory_space<vmem>>, vector<1x192xf32>
    %cst = arith.constant dense<0.000000e+00> : vector<1x192xf32>
    %10 = tpu.matmul %4, %7, %cst {dimension_numbers = #tpu.dot_dimension_numbers<[1], [0], [0], [1], [0, 0, 1, 1], [], []>} : vector<1x8xf32>, vector<8x192xf32>, vector<1x192xf32> -> vector<1x192xf32>
    %11 = arith.addf %10, %9 : vector<1x192xf32>
    %12 = vector.extract_strided_slice %11 {offsets = [0, 0], sizes = [1, 64], strides = [1, 1]} : vector<1x192xf32> to vector<1x64xf32>
    %13 = vector.extract_strided_slice %8 {offsets = [0, 0], sizes = [16, 64], strides = [1, 1]} : vector<16x192xf32> to vector<16x64xf32>
    %cst_10 = arith.constant dense<0.000000e+00> : vector<1x64xf32>
    %14 = tpu.matmul %5, %13, %cst_10 {dimension_numbers = #tpu.dot_dimension_numbers<[1], [0], [0], [1], [0, 0, 1, 1], [], []>} : vector<1x16xf32>, vector<16x64xf32>, vector<1x64xf32> -> vector<1x64xf32>
    %15 = arith.addf %12, %14 : vector<1x64xf32>
    %16 = vector.extract_strided_slice %15 {offsets = [0, 0], sizes = [1, 48], strides = [1, 1]} : vector<1x64xf32> to vector<1x48xf32>
    %17 = arith.negf %16 : vector<1x48xf32>
    %18 = math.exp %17 : vector<1x48xf32>
    %cst_11 = arith.constant 1.000000e+00 : f32
    %19 = vector.broadcast %cst_11 : f32 to vector<1x48xf32>
    %20 = arith.addf %19, %18 : vector<1x48xf32>
    %21 = arith.divf %19, %20 : vector<1x48xf32>
    %22 = vector.extract_strided_slice %15 {offsets = [0, 48], sizes = [1, 16], strides = [1, 1]} : vector<1x64xf32> to vector<1x16xf32>
    %23 = math.tanh %22 : vector<1x16xf32>
    %24 = vector.extract_strided_slice %21 {offsets = [0, 0], sizes = [1, 16], strides = [1, 1]} : vector<1x48xf32> to vector<1x16xf32>
    %25 = vector.extract_strided_slice %21 {offsets = [0, 16], sizes = [1, 16], strides = [1, 1]} : vector<1x48xf32> to vector<1x16xf32>
    %26 = vector.extract_strided_slice %21 {offsets = [0, 32], sizes = [1, 16], strides = [1, 1]} : vector<1x48xf32> to vector<1x16xf32>
    %27 = arith.mulf %25, %6 : vector<1x16xf32>
    %28 = arith.mulf %24, %23 : vector<1x16xf32>
    %29 = arith.addf %27, %28 : vector<1x16xf32>
    %30 = math.tanh %29 : vector<1x16xf32>
    %31 = arith.mulf %26, %30 : vector<1x16xf32>
    %c0_12 = arith.constant 0 : index
    %c0_13 = arith.constant 0 : index
    %32 = vector.load %arg6[%c0_12, %c0_13] : memref<1x48xf32, #tpu.memory_space<vmem>>, vector<1x16xf32>
    tpu.vector_store %arg6[%c0_12, %c0_13], %31 {strides = array<i32>} : memref<1x48xf32, #tpu.memory_space<vmem>>, vector<1x16xf32>,
    %33 = vector.extract_strided_slice %11 {offsets = [0, 64], sizes = [1, 64], strides = [1, 1]} : vector<1x192xf32> to vector<1x64xf32>
    %34 = vector.extract_strided_slice %8 {offsets = [0, 64], sizes = [16, 64], strides = [1, 1]} : vector<16x192xf32> to vector<16x64xf32>
    %cst_14 = arith.constant dense<0.000000e+00> : vector<1x64xf32>
    %35 = tpu.matmul %31, %34, %cst_14 {dimension_numbers = #tpu.dot_dimension_numbers<[1], [0], [0], [1], [0, 0, 1, 1], [], []>} : vector<1x16xf32>, vector<16x64xf32>, vector<1x64xf32> -> vector<1x64xf32>
    %36 = arith.addf %33, %35 : vector<1x64xf32>
    %37 = vector.extract_strided_slice %36 {offsets = [0, 0], sizes = [1, 48], strides = [1, 1]} : vector<1x64xf32> to vector<1x48xf32>
    %38 = arith.negf %37 : vector<1x48xf32>
    %39 = math.exp %38 : vector<1x48xf32>
    %cst_15 = arith.constant 1.000000e+00 : f32
    %40 = vector.broadcast %cst_15 : f32 to vector<1x48xf32>
    %41 = arith.addf %40, %39 : vector<1x48xf32>
    %42 = arith.divf %40, %41 : vector<1x48xf32>
    %43 = vector.extract_strided_slice %36 {offsets = [0, 48], sizes = [1, 16], strides = [1, 1]} : vector<1x64xf32> to vector<1x16xf32>
    %44 = math.tanh %43 : vector<1x16xf32>
    %45 = vector.extract_strided_slice %42 {offsets = [0, 0], sizes = [1, 16], strides = [1, 1]} : vector<1x48xf32> to vector<1x16xf32>
    %46 = vector.extract_strided_slice %42 {offsets = [0, 16], sizes = [1, 16], strides = [1, 1]} : vector<1x48xf32> to vector<1x16xf32>
    %47 = vector.extract_strided_slice %42 {offsets = [0, 32], sizes = [1, 16], strides = [1, 1]} : vector<1x48xf32> to vector<1x16xf32>
    %48 = arith.mulf %46, %29 : vector<1x16xf32>
    %49 = arith.mulf %45, %44 : vector<1x16xf32>
    %50 = arith.addf %48, %49 : vector<1x16xf32>
    %51 = math.tanh %50 : vector<1x16xf32>
    %52 = arith.mulf %47, %51 : vector<1x16xf32>
    %c0_16 = arith.constant 0 : index
    %c16_17 = arith.constant 16 : index
    %53 = vector.load %arg6[%c0_16, %c16_17] : memref<1x48xf32, #tpu.memory_space<vmem>>, vector<1x16xf32>
    tpu.vector_store %arg6[%c0_16, %c16_17], %52 {strides = array<i32>} : memref<1x48xf32, #tpu.memory_space<vmem>>, vector<1x16xf32>,
    %54 = vector.extract_strided_slice %11 {offsets = [0, 128], sizes = [1, 64], strides = [1, 1]} : vector<1x192xf32> to vector<1x64xf32>
    %55 = vector.extract_strided_slice %8 {offsets = [0, 128], sizes = [16, 64], strides = [1, 1]} : vector<16x192xf32> to vector<16x64xf32>
    %cst_18 = arith.constant dense<0.000000e+00> : vector<1x64xf32>
    %56 = tpu.matmul %52, %55, %cst_18 {dimension_numbers = #tpu.dot_dimension_numbers<[1], [0], [0], [1], [0, 0, 1, 1], [], []>} : vector<1x16xf32>, vector<16x64xf32>, vector<1x64xf32> -> vector<1x64xf32>
    %57 = arith.addf %54, %56 : vector<1x64xf32>
    %58 = vector.extract_strided_slice %57 {offsets = [0, 0], sizes = [1, 48], strides = [1, 1]} : vector<1x64xf32> to vector<1x48xf32>
    %59 = arith.negf %58 : vector<1x48xf32>
    %60 = math.exp %59 : vector<1x48xf32>
    %cst_19 = arith.constant 1.000000e+00 : f32
    %61 = vector.broadcast %cst_19 : f32 to vector<1x48xf32>
    %62 = arith.addf %61, %60 : vector<1x48xf32>
    %63 = arith.divf %61, %62 : vector<1x48xf32>
    %64 = vector.extract_strided_slice %57 {offsets = [0, 48], sizes = [1, 16], strides = [1, 1]} : vector<1x64xf32> to vector<1x16xf32>
    %65 = math.tanh %64 : vector<1x16xf32>
    %66 = vector.extract_strided_slice %63 {offsets = [0, 0], sizes = [1, 16], strides = [1, 1]} : vector<1x48xf32> to vector<1x16xf32>
    %67 = vector.extract_strided_slice %63 {offsets = [0, 16], sizes = [1, 16], strides = [1, 1]} : vector<1x48xf32> to vector<1x16xf32>
    %68 = vector.extract_strided_slice %63 {offsets = [0, 32], sizes = [1, 16], strides = [1, 1]} : vector<1x48xf32> to vector<1x16xf32>
    %69 = arith.mulf %67, %50 : vector<1x16xf32>
    %70 = arith.mulf %66, %65 : vector<1x16xf32>
    %71 = arith.addf %69, %70 : vector<1x16xf32>
    %72 = math.tanh %71 : vector<1x16xf32>
    %73 = arith.mulf %68, %72 : vector<1x16xf32>
    %c0_20 = arith.constant 0 : index
    %c32 = arith.constant 32 : index
    %74 = vector.load %arg6[%c0_20, %c32] : memref<1x48xf32, #tpu.memory_space<vmem>>, vector<1x16xf32>
    tpu.vector_store %arg6[%c0_20, %c32], %73 {strides = array<i32>} : memref<1x48xf32, #tpu.memory_space<vmem>>, vector<1x16xf32>,
    %c32_21 = arith.constant 32 : index
    %c0_22 = arith.constant 0 : index
    %75 = vector.load %arg3[%c32_21, %c0_22] : memref<80x192xf32, #tpu.memory_space<vmem>>, vector<48x19xf32>
    %c25 = arith.constant 25 : index
    %c0_23 = arith.constant 0 : index
    %76 = vector.load %arg3[%c25, %c0_23] : memref<80x192xf32, #tpu.memory_space<vmem>>, vector<1x19xf32>
    %c0_24 = arith.constant 0 : index
    %c0_25 = arith.constant 0 : index
    %77 = vector.load %arg6[%c0_24, %c0_25] : memref<1x48xf32, #tpu.memory_space<vmem>>, vector<1x48xf32>
    %cst_26 = arith.constant dense<0.000000e+00> : vector<1x19xf32>
    %78 = tpu.matmul %77, %75, %cst_26 {dimension_numbers = #tpu.dot_dimension_numbers<[1], [0], [0], [1], [0, 0, 1, 1], [], []>} : vector<1x48xf32>, vector<48x19xf32>, vector<1x19xf32> -> vector<1x19xf32>
    %79 = arith.addf %78, %76 : vector<1x19xf32>
    %c0_27 = arith.constant 0 : index
    %c0_28 = arith.constant 0 : index
    %80 = vector.load %arg5[%c0_27, %c0_28] : memref<1x32xf32, #tpu.memory_space<vmem>>, vector<1x16xf32>
    tpu.vector_store %arg5[%c0_27, %c0_28], %73 {strides = array<i32>} : memref<1x32xf32, #tpu.memory_space<vmem>>, vector<1x16xf32>,
    %c0_29 = arith.constant 0 : index
    %c16_30 = arith.constant 16 : index
    %81 = vector.load %arg5[%c0_29, %c16_30] : memref<1x32xf32, #tpu.memory_space<vmem>>, vector<1x16xf32>
    tpu.vector_store %arg5[%c0_29, %c16_30], %71 {strides = array<i32>} : memref<1x32xf32, #tpu.memory_space<vmem>>, vector<1x16xf32>,
    %cst_31 = arith.constant 0.000000e+00 : f32
    %82 = vector.broadcast %cst_31 : f32 to vector<1x77xf32>
    %83 = tpu.concatenate %79, %73, %71, %82 in 1 : vector<1x19xf32>, vector<1x16xf32>, vector<1x16xf32>, vector<1x77xf32> -> vector<1x128xf32>
    %c0_32 = arith.constant 0 : index
    %c0_33 = arith.constant 0 : index
    %c0_34 = arith.constant 0 : index
    %84 = vector.load %arg4[%c0_32, %c0_33, %c0_34] : memref<1x1x128xf32, #tpu.memory_space<vmem>>, vector<1x1x128xf32>
    %85 = vector.shape_cast %84 : vector<1x1x128xf32> to vector<1x128xf32>
    %86 = vector.shape_cast %83 : vector<1x128xf32> to vector<1x1x128xf32>
    tpu.vector_store %arg4[%c0_32, %c0_33, %c0_34], %86 {strides = array<i32>} : memref<1x1x128xf32, #tpu.memory_space<vmem>>, vector<1x1x128xf32>,
    return
  }
  func.func @transform_0(%arg0: i32) -> (i32, i32, i32) {
    %c0_i32 = arith.constant 0 : i32
    %c0_i32_0 = arith.constant 0 : i32
    %c0_i32_1 = arith.constant 0 : i32
    return %arg0, %c0_i32, %c0_i32_0 : i32, i32, i32
  }
  func.func @transform_1(%arg0: i32) -> (i32, i32) {
    %c0_i32 = arith.constant 0 : i32
    %c0_i32_0 = arith.constant 0 : i32
    %c0_i32_1 = arith.constant 0 : i32
    return %c0_i32, %c0_i32_0 : i32, i32
  }
  func.func @transform_2(%arg0: i32) -> (i32, i32) {
    %c0_i32 = arith.constant 0 : i32
    %c0_i32_0 = arith.constant 0 : i32
    %c0_i32_1 = arith.constant 0 : i32
    return %c0_i32, %c0_i32_0 : i32, i32
  }
  func.func @transform_3(%arg0: i32) -> (i32, i32, i32) {
    %c0_i32 = arith.constant 0 : i32
    %c0_i32_0 = arith.constant 0 : i32
    %c0_i32_1 = arith.constant 0 : i32
    return %arg0, %c0_i32, %c0_i32_0 : i32, i32, i32
  }
}

</mosaic_0001>

<bundles_post_ra>
// kernel: tpu_custom_call.1
= control target key start
LH: loop header
LB: loop body
LE: loop exit
PB: predicated region body
PF: predicated region fallthrough
CT: control target
= control target key end

     0   :  { %8 = vsyncpa [#allocation5], 0  ;;  %s1417_s0 = inlined_call_operand.hbm [shape: f32[8,1,8], index: 0, kind: input, shape index: {}]   ;;  %s1418_s1 = inlined_call_operand.vmem [shape: f32[1,32], index: 1, kind: input, shape index: {}]   ;;  %s1419_s2 = inlined_call_operand.hbm [shape: f32[80,192], index: 2, kind: input, shape index: {}]   ;;  %s1420_s3 = inlined_call_operand.hbm [shape: f32[8,1,128], index: 3, kind: output, shape index: {}]  }
   0x1   :  { %10 = vsyncpa [#allocation5 + $0x1], 0 }
   0x2   :  { %11 = vsyncpa [#allocation8], 0 }
   0x3   :  { %12 = vsyncpa [#allocation6], 0 }
   0x4   :  { %14 = vsyncpa [#allocation6 + $0x1], 0  ;;  %s1171_s12 = smov 0   ;;  %s1173_s13 = smov 0  }
   0x5   :  { %s1175_s14 = smov 0   ;;  %s1177_s15 = smov 0  }
   0x6 LB: > { %s1192_s16 = sadd.s32 4294967295, %s1133_s15   ;;  %s817_s17 = sadd.s32 4294967294, %s1133_s15   ;;  %s1133_s15 = sphi %s1177_s15, %s1440_s15   ;;  %s1129_s14 = sphi %s1175_s14, %s1439_s14   ;;  %s1125_s13 = sphi %s1173_s13, %s1438_s13   ;;  %s1121_s12 = sphi %s1171_s12, %s1437_s12  }
   0x7   : > { %p40_p0 = scmp.ne.s32.totalorder %s1125_s13, %s1121_s12  ;;  %p1421_p1 = scmp.eq.s32.totalorder %s1192_s16, 0 }
   0x8   : > { %p112_p3 = scmp.eq.s32.totalorder %s817_s17, 7  ;;  %p818_p5 = scmp.ge.s32.totalorder %s1133_s15, 1 }
   0x9   : > { %p1201_p4 = por %p1421_p1, %p40_p0  ;;  %p119_p7 = scmp.lt.s32.totalorder %s1133_s15, 9 }
   0xa   : > { %p1206_p6 = por %p112_p3, %p40_p0  ;;  %s1135_s21 = smov [#allocation7]  }
   0xb   : > { %s1424_s18 = scalar_select %p1201_p4, 1, 0 }
   0xc   : > { %s1425_s19 = scalar_select %p1206_p6, 1, 0 }
   0xd   : > { %p1212_p9 = pnand %p818_p5, %p119_p7  ;;  %s134_s22 = sshll.u32 %s1135_s21, 4  ;;  %s135_s22 = int_to_ptr.vmem [resolvable:$true] %s134_s22 }
   0xe   : > { %s1225_s24 = sadd.s32 1, %s1133_s15   ;;  %s27_s25 = sadd.s32 1, %s1129_s14 }
   0xf   : > { %s1426_s20 = scalar_select %p1212_p9, 1, 0 }
  0x10   : > { %p914_p10 = pneg %p1212_p9  ;;  %s24_s26 = ssub.s32 %s1133_s15, %s1225_s24 }
  0x11   : > { %s1005_s29 = scalar_lea.hbm %s1419_s2, 2560 }
  0x12   : > { %p1220_p11 = pnand %p914_p10, %p1421_p1  ;;  %p1006_p12 = scmp.ne.s32.totalorder %s1419_s2, %s1005_s29 }
  0x13   : > { %p1012_p5 = scmp.lt.u32.totalorder %s1005_s29, %s1419_s2 }
  0x14   : > { %p1007_p13 = pneg %p1220_p11 }
  0x16   : > { %p1008_p0 = pnand %p1007_p13, %p1006_p12 }
  0x18   : > { %p1009_p3 = pneg %p1008_p0 }
  0x1a   : > { %p1014_p7 = pnand %p1012_p5, %p1009_p3 }
  0x1c   : > { %1017 = shalt.err (!%p1014_p7)
}
  0x1d   : > { %s1018_s7 = scalar_lea.vmem %s135_s22, 2560  ;;  %p1026_p2 = scmp.lt.s32.totalorder %s135_s22, %s135_s22 }
  0x1e   : > { %p1019_p10 = scmp.ne.s32.totalorder %s135_s22, %s1018_s7  ;;  %p1027_p6 = scmp.lt.s32.totalorder %s1018_s7, %s1018_s7 }
  0x20   : > { %p1021_p8 = pnand %p1019_p10, %p1007_p13  ;;  %p1028_p4 = por %p1027_p6, %p1026_p2 }
  0x22   : > { %p1022_p1 = pneg %p1021_p8 }
  0x24   : > { %p1029_p9 = pnand %p1028_p4, %p1022_p1 }
  0x26   : > { %1032 = shalt.err (!%p1029_p9)
}
  0x27   : > { %s1136_s8 = smov 256   ;;  %s1137_s9 = smov 16  }
  0x28   : > { %917 = dma.hbm_to_vmem [thread:$0]  (!%p1220_p11), %s1419_s2, 2560, %s135_s22, [#allocation8], %s1136_s8, %s1136_s8, %s1137_s9  }
  0x29   : > { %p25_p8 = scmp.eq.s32.totalorder %s24_s26, 0  ;;  %p34_p2 = scmp.ne.s32.totalorder %s1129_s14, %s1125_s13 }
  0x2a   : > { %p35_p1 = scmp.eq.s32.totalorder %s1133_s15, 0  ;;  %p927_p4 = scmp.lt.s32.totalorder %s1133_s15, 8 }
  0x2b   : > { %s1251_s17 = scalar_select %p25_p8, %s1129_s14, %s27_s25  }
  0x2c   : > { %p36_p6 = por %p35_p1, %p34_p2  ;;  %p1428_p9 = scmp.eq.s32.totalorder %s1192_s16, 7 }
  0x2d   : > { %s148_s27 = sand.u32 1, %s1129_s14   ;;  %s821_s28 = sshll.u32 %s1133_s15, 4 }
  0x2e   : > { %p1255_p12 = por %p1428_p9, %p34_p2  ;;  %s1264_s30 = scalar_lea.hbm %s1417_s0, %s821_s28 }
  0x2f   : > { %s151_s22 = scalar_lea.vmem [#allocation4], %s148_s27  ;;  %p1268_p11 = pnand %p927_p4, %p36_p6 }
  0x30   : > { %s158_s25 = sshll.u32 %s151_s22, 4  ;;  %s149_s4 = scalar_lea.sflag [#allocation5], %s148_s27  ;;  %s1266_s25 = int_to_ptr.vmem [resolvable:$true] %s158_s25 }
  0x31   : > { %s1033_s5 = scalar_lea.hbm %s1264_s30, 16  ;;  %p1035_p0 = pneg %p1268_p11 }
  0x32   : > { %p1034_p13 = scmp.ne.s32.totalorder %s1264_s30, %s1033_s5  ;;  %s1038_s8 = scalar_lea.hbm %s1417_s0, 128 }
  0x33   : > { %p1039_p7 = scmp.lt.u32.totalorder %s1264_s30, %s1417_s0  ;;  %p1040_p10 = scmp.lt.u32.totalorder %s1038_s8, %s1033_s5 }
  0x34   : > { %p1036_p3 = pnand %p1035_p0, %p1034_p13  ;;  %p1042_p2 = scmp.lt.u32.totalorder %s1033_s5, %s1264_s30 }
  0x35   : > { %p1041_p8 = por %p1040_p10, %p1039_p7 }
  0x36   : > { %p1037_p5 = pneg %p1036_p3 }
  0x37   : > { %p1043_p1 = por %p1042_p2, %p1041_p8 }
  0x39   : > { %p1044_p4 = pnand %p1043_p1, %p1037_p5 }
  0x3b   : > { %1047 = shalt.err (!%p1044_p4)
}
  0x3c   : > { %s1048_s11 = scalar_lea.vmem %s1266_s25, 16  ;;  %s1138_s27 = smov [#allocation4]  }
  0x3d   : > { %p1049_p6 = scmp.ne.s32.totalorder %s1266_s25, %s1048_s11  ;;  %s1053_s28 = sshll.u32 %s1138_s27, 4  ;;  %s1054_s28 = int_to_ptr.vmem [resolvable:$false] %s1053_s28 }
  0x3e   : > { %s1055_s29 = scalar_lea.vmem %s1054_s28, 32  ;;  %p1056_p3 = scmp.lt.s32.totalorder %s1266_s25, %s1054_s28 }
  0x3f   : > { %p1051_p9 = pnand %p1049_p6, %p1035_p0  ;;  %p1057_p7 = scmp.lt.s32.totalorder %s1055_s29, %s1048_s11 }
  0x41   : > { %p1052_p13 = pneg %p1051_p9  ;;  %p1058_p10 = por %p1057_p7, %p1056_p3 }
  0x43   : > { %p1059_p8 = pnand %p1058_p10, %p1052_p13 }
  0x45   : > { %1062 = shalt.err (!%p1059_p8)
}
  0x46   : > { %921 = dma.hbm_to_vmem [thread:$0]  (!%p1268_p11), %s1264_s30, 16, %s1266_s25, %s149_s4  }
  0x47   : > { %p1431_p5 = scmp.ne.s32.totalorder %s1426_s20, 0 }
  0x48   : > { %s1300_s23 = sand.u32 (!%p1431_p5), 1, %s1125_s13   ;;  %p1432_p0 = scmp.ne.s32.totalorder (!%p1431_p5), %s1424_s18, 0 }
  0x49   : > { %167 = sbr.rel (%p1431_p5) target bundleno = 2445 (0x98d), region = 32  ;;  %s170_s22 = scalar_lea.sflag (!%p1431_p5), [#allocation5], %s1300_s23 }
  0x4a   : > { %s172_s5 = scalar_lea.vmem (!%p1431_p5), [#allocation4], %s1300_s23 }
  0x50   : > { %1108 = dma.done.wait (%p1432_p0), %s170_s22, 16  }
  0x51   : > { %1110 = vsyncadd (%p1432_p0), %s170_s22, 4294967280  ;;  %p1433_p2 = scmp.eq.s32.totalorder %s1192_s16, 0 }
  0x53   : > { %1112 = dma.done.wait (%p1433_p2), [#allocation8], 2560   ;;  %p1434_p11 = pmov %p1433_p2 }
  0x54   : > { %s196_s20 = scalar_lea.vmem [#allocation9], %s1300_s23  ;;  %p1435_p1 = scmp.ne.s32.totalorder %s1192_s16, 0 }
  0x55   : > { %1114 = vsyncadd (%p1434_p11), [#allocation8], 4294964736  ;;  %v201_v0 = vld [vmem:[%s1418_s1] sm:$0x1] (!%p1435_p1)  ;;  %vm202_vm0 = vcmask (!%p1435_p1), 253952  }
  0x56   : > { %200 = sbr.rel (%p1435_p1) target bundleno = 93 (0x5d), region = 44  ;;  %203 = vst.msk [vmem:[#allocation2] sm:$0x1] (!%p1435_p1), %vm202_vm0, %v201_v0 }
  0x5d PF: > { %v207_v1 = vld [vmem:[#allocation7 + $0x8] sm:$0xff]  ;;  %v206_v2 = vld [vmem:[#allocation7] sm:$0xff]  ;;  %v204_v3 = vld [vmem:[%s172_s5] sm:$0x1]  ;;  %v1139_v4 = vmov 0.0   ;;  %vm225_vm1 = vcmask 64512   ;;  %v215_v11 = vlaneseq }
  0x5e   : > { %229 = vmatprep.subr.mxu0 %v207_v1  ;;  %293 = vmatprep.mubr.f32.mxu0 %v1139_v4  ;;  %v208_v5 = vld [vmem:[#allocation7 + $0x10] sm:$0xff]  ;;  %v210_v6 = vld [vmem:[#allocation7 + $0x20] sm:$0xff]  ;;  %v1140_v7 = vmov 0.0|0.0   ;;  %vm1141_vm2 = vmmov 0   ;;  %v205_v10 = vld [vmem:[#allocation2] sm:$0x1] }
  0x5f   : > { %230 = vmatpush1.msra.mxu0 %v206_v2  ;;  %888 = vmatprep.subr.bf16.mxu1 %v1140_v7  ;;  %v976_v8 = vpack.i.bf16 %v210_v6, %v208_v5  ;;  %v889_v9 = vpack.c.bf16 %v210_v6, %v208_v5  ;;  %vm300_vm3 = vcmask 130048   ;;  %v1329_v12 = vshrl.u32 %v215_v11, 7  ;;  %v1332_v14 = vld [vmem:[#allocation7 + $0x30] ss:$8 sm:$0x3]  ;;  %s1142_s18 = smov 80  }
  0x60   : > { %825 = vmatmul.mubr.msk.f32.vlgmr.msra.gmra.mrb[0].mxu0 %vm225_vm1, %v204_v3  ;;  %856 = vmatprep.mubr.msk.f32.mxu1 %vm1141_vm2, %v1139_v4  ;;  %s1143_s26 = smov 16   ;;  %s1144_s4 = smov 64   ;;  %vm403_vm4 = vcmask 122880   ;;  %v209_v55 = vld [vmem:[#allocation7 + $0x18] sm:$0xff]  ;;  %v211_v56 = vld [vmem:[#allocation7 + $0x28] sm:$0xff]  ;;  %vm522_vm5 = vcmask 254080  }
  0x61   : > { %890 = vmatpush3.bf16.msra.mxu1 %v889_v9  ;;  %897 = vmatprep.subr.bf16.mxu0 %v1140_v7  ;;  %v217_v13 = vsub.s32 0, %v1329_v12  ;;  %s1145_s6 = smov 96   ;;  %v895_v57 = vpack.c.bf16 %v211_v56, %v209_v55  ;;  %s1146_s7 = smov 32   ;;  %v221_v62 = vsub.s32 1, %v1329_v12  ;;  %v629_v12 = vld [vmem:[#allocation7 + $0x40] sm:$0xff]  ;;  %vm627_vm6 = vcmask 385280  }
  0x62   : > { %891 = vmatprep.subr.bf16.mxu1 %v1140_v7  ;;  %885 = vmatprep.mubr.msk.f32.mxu0 %vm1141_vm2, %v1139_v4  ;;  %s1147_s8 = smov 48   ;;  %s1148_s9 = smov 19   ;;  %vm637_vm7 = vcmask 392192   ;;  %vm724_vm8 = vcmask 154624   ;;  %vm726_vm9 = vcmask 285696   ;;  %vm728_vm10 = vcmask 416768  }
  0x63   : > { %v218_v15 = vrot.slane %v1332_v14, %v217_v13  ;;  %v222_v63 = vrot.slane %v1332_v14, %v221_v62  ;;  %v630_v13 = vld [vmem:[#allocation7 + $0x50] sm:$0xff]  ;;  %s1149_s10 = smov 115   ;;  %s833_s11 = sshll.u32 %s1192_s16, 4 }
  0x64   : > { %857 = vmatmul.mubr.msk.f32.vlgmr.msra.gmra.mrb[0].mxu1 %vm300_vm3, %v205_v10  ;;  %v898_v14 = vpack.c.bf16 %v630_v13, %v629_v12  ;;  %s744_s27 = sshll.u32 %s196_s20, 4  ;;  %s1372_s22 = scalar_lea.hbm %s1420_s3, %s833_s11  ;;  %s1374_s27 = int_to_ptr.vmem [resolvable:$true] %s744_s27 }
  0x65   : > { %863 = vmatprep.mubr.msk.f32.mxu1 %vm1141_vm2, %v1139_v4  ;;  %s732_s16 = scalar_lea.sflag [#allocation6], %s1300_s23  ;;  %s1063_s5 = scalar_lea.vmem %s1374_s27, 16 }
  0x66   : > { %899 = vmatpush3.bf16.msra.mxu0 %v898_v14  ;;  %p1064_p4 = scmp.ne.s32.totalorder %s1374_s27, %s1063_s5  ;;  %s1150_s30 = smov [#allocation9]  }
  0x67   : > { %900 = vmatprep.subr.bf16.mxu0 %v1140_v7  ;;  %s1067_s25 = sshll.u32 %s1150_s30, 4  ;;  %s1068_s25 = int_to_ptr.vmem [resolvable:$false] %s1067_s25 }
  0x68   : > { %p1065_p6 = pnand %p1064_p4, %p1255_p12  ;;  %p1070_p13 = scmp.lt.s32.totalorder %s1374_s27, %s1068_s25 }
  0x6a   : > { %p1066_p9 = pneg %p1065_p6 }
 0x133   : > { %v295_v16 = vpop.f32.mrb[0].mxu0 }
 0x134   : > { %v296_v17 = vadd.f32 %v295_v16, %v218_v15  ;;  %v1335_v18 = vpop.f32.mrb[1].mxu0 }
 0x135   : > { %v298_v0 = vadd.f32 %v1335_v18, %v222_v63 }
 0x137   : > { %v370_v19 = vpop.f32.mrb[0].mxu1 }
 0x138   : > { %v374_v20 = vadd.f32 %v370_v19, %v296_v17  ;;  %v858_v21 = vpop.f32.mrb[1].mxu1  ;;  %v631_v19 = vld [vmem:[#allocation7 + $0x60] sm:$0xff] }
 0x13a   : > { %981 = vtanh.f32 %v374_v20  ;;  %v827_v23 = vmul.f32 -1.442695, %v374_v20  ;;  %v632_v20 = vld [vmem:[#allocation7 + $0x70] sm:$0xff] }
 0x13b   : > { %v901_v21 = vpack.c.bf16 %v632_v20, %v631_v19 }
 0x13c   : > { %983 = vpow2.f32 %v827_v23  ;;  %v633_v23 = vld [vmem:[#allocation7 + $0x80] sm:$0xff] }
 0x13d   : > { %902 = vmatpush3.bf16.msra.mxu0 %v901_v21 }
 0x13e   : > { %903 = vmatprep.subr.bf16.mxu0 %v1140_v7 }
 0x144   : > { %v982_v22 = vpop.eup %981 }
 0x145   : > { %384 = vrot.lane.b32.xlu0 %v982_v22, %s1142_s18 }
 0x146   : > { %v984_v24 = vpop.eup %983 }
 0x147   : > { %v378_v25 = vadd.f32 1.0, %v984_v24  ;;  %v634_v24 = vld [vmem:[#allocation7 + $0x90] sm:$0xff] }
 0x149   : > { %985 = vrcp.f32 %v378_v25  ;;  %v904_v25 = vpack.c.bf16 %v634_v24, %v633_v23 }
 0x14b   : > { %905 = vmatpush3.bf16.msra.mxu0 %v904_v25 }
 0x153   : > { %v986_v26 = vpop.eup %985 }
 0x154   : > { %v382_v29 = vmul.f32 %v986_v26, %v205_v10 }
 0x1b7   : > { %v385_v27 = vpop.permute.xlu0 %384 }
 0x1b8   : > { %v387_v28 = vmul.f32 %v986_v26, %v385_v27 }
 0x1ba   : > { %389 = vrot.lane.b32.xlu0 %v387_v28, %s1143_s26 }
 0x22c   : > { %v390_v30 = vpop.permute.xlu0 %389 }
 0x22d   : > { %v392_v31 = vadd.f32 %v390_v30, %v382_v29 }
 0x22f   : > { %987 = vtanh.f32 %v392_v31 }
 0x239   : > { %v988_v32 = vpop.eup %987 }
 0x23a   : > { %395 = vrot.lane.b32.xlu1 %v988_v32, %s1143_s26 }
 0x23e   : > { %977 = vrot.lane.b32.xlu1 %v976_v8, %s1144_s4 }
 0x2ac   : > { %v396_v33 = vpop.permute.xlu1 %395 }
 0x2ad   : > { %v398_v34 = vmul.f32 %v986_v26, %v396_v33 }
 0x2af   : > { %400 = vrot.lane.b32.xlu0 %v398_v34, %s1145_s6 }
 0x2b0   : > { %v978_v35 = vpop.permute.xlu1 %977 }
 0x2b1   : > { %v980_v36 = vunpack.i.h.bf16 %v978_v35  ;;  %v979_v37 = vunpack.i.l.bf16 %v978_v35 }
 0x2b3   : > { %v892_v38 = vpack.c.bf16 %v980_v36, %v979_v37 }
 0x2b5   : > { %893 = vmatpush3.bf16.msra.mxu1 %v892_v38 }
 0x2b6   : > { %894 = vmatprep.subr.bf16.mxu1 %v1140_v7 }
 0x321   : > { %v401_v39 = vpop.permute.xlu0 %400 }
 0x322   : > { %404 = vst.msk [vmem:[#allocation3] sm:$0x1] %vm403_vm4, %v401_v39  ;;  %864 = vmatmul.mubr.msk.f32.vlgmr.msra.gmra.mrb[2].mxu1 %vm300_vm3, %v401_v39 }
 0x323   : > { %870 = vmatprep.mubr.msk.f32.mxu1 %vm1141_vm2, %v1139_v4  ;;  %896 = vmatpush3.bf16.msra.mxu1 %v895_v57 }
 0x3f5   : > { %v481_v40 = vpop.f32.mrb[2].mxu1 }
 0x3f6   : > { %486 = vrot.lane.b32.xlu1 %v481_v40, %s1144_s4  ;;  %v865_v41 = vpop.f32.mrb[3].mxu1 }
 0x3fa   : > { %498 = vrot.lane.b32.xlu1 %v392_v31, %s1144_s4  ;;  %v635_v31 = vld [vmem:[#allocation7 + $0x31] ss:$0 sm:$0xff] }
 0x468   : > { %v487_v42 = vpop.permute.xlu1 %486 }
 0x469   : > { %v489_v43 = vadd.f32 %v487_v42, %v296_v17 }
 0x46b   : > { %989 = vtanh.f32 %v489_v43  ;;  %v829_v45 = vmul.f32 -1.442695, %v489_v43 }
 0x46c   : > { %v499_v51 = vpop.permute.xlu1 %498 }
 0x46d   : > { %991 = vpow2.f32 %v829_v45 }
 0x475   : > { %v990_v44 = vpop.eup %989 }
 0x476   : > { %503 = vrot.lane.b32.xlu0 %v990_v44, %s1142_s18 }
 0x477   : > { %v992_v46 = vpop.eup %991 }
 0x478   : > { %v493_v47 = vadd.f32 1.0, %v992_v46 }
 0x47a   : > { %993 = vrcp.f32 %v493_v47 }
 0x484   : > { %v994_v48 = vpop.eup %993 }
 0x485   : > { %v501_v52 = vmul.f32 %v994_v48, %v499_v51 }
 0x4e8   : > { %v504_v49 = vpop.permute.xlu0 %503 }
 0x4e9   : > { %v506_v50 = vmul.f32 %v994_v48, %v504_v49 }
 0x4eb   : > { %508 = vrot.lane.b32.xlu0 %v506_v50, %s1143_s26 }
 0x55d   : > { %v509_v53 = vpop.permute.xlu0 %508 }
 0x55e   : > { %v511_v54 = vadd.f32 %v509_v53, %v501_v52 }
 0x560   : > { %995 = vtanh.f32 %v511_v54 }
 0x56a   : > { %v996_v58 = vpop.eup %995 }
 0x56b   : > { %514 = vrot.lane.b32.xlu1 %v996_v58, %s1143_s26 }
 0x5dd   : > { %v515_v59 = vpop.permute.xlu1 %514 }
 0x5de   : > { %v517_v60 = vmul.f32 %v994_v48, %v515_v59 }
 0x5e0   : > { %524 = vrot.lane.b32.xlu0 %v517_v60, %s1146_s7 }
 0x5e4   : > { %607 = vrot.lane.b32.xlu0 %v511_v54, %s1144_s4 }
 0x652   : > { %v525_v61 = vpop.permute.xlu0 %524 }
 0x653   : > { %871 = vmatmul.mubr.msk.f32.vlgmr.msra.gmra.mrb[4].mxu1 %vm300_vm3, %v525_v61 }
 0x656   : > { %v608_v15 = vpop.permute.xlu0 %607 }
 0x726   : > { %v594_v1 = vpop.f32.mrb[4].mxu1 }
 0x727   : > { %v598_v2 = vadd.f32 %v594_v1, %v298_v0  ;;  %v872_v3 = vpop.f32.mrb[5].mxu1 }
 0x729   : > { %997 = vtanh.f32 %v598_v2  ;;  %v831_v5 = vmul.f32 -1.442695, %v598_v2 }
 0x72b   : > { %999 = vpow2.f32 %v831_v5 }
 0x733   : > { %v998_v4 = vpop.eup %997 }
 0x734   : > { %612 = vrot.lane.b32.xlu1 %v998_v4, %s1142_s18  ;;  %s1069_s18 = scalar_lea.vmem %s1068_s25, 32 }
 0x735   : > { %v1000_v6 = vpop.eup %999  ;;  %p1071_p3 = scmp.lt.s32.totalorder %s1069_s18, %s1063_s5 }
 0x736   : > { %v602_v8 = vadd.f32 1.0, %v1000_v6 }
 0x737   : > { %p1072_p7 = por %p1071_p3, %p1070_p13 }
 0x738   : > { %1001 = vrcp.f32 %v602_v8 }
 0x739   : > { %p1073_p10 = pnand %p1072_p7, %p1066_p9 }
 0x742   : > { %v1002_v9 = vpop.eup %1001 }
 0x743   : > { %v610_v16 = vmul.f32 %v1002_v9, %v608_v15 }
 0x7a6   : > { %v613_v10 = vpop.permute.xlu1 %612 }
 0x7a7   : > { %v615_v11 = vmul.f32 %v1002_v9, %v613_v10 }
 0x7a9   : > { %617 = vrot.lane.b32.xlu1 %v615_v11, %s1143_s26 }
 0x7ad   : > { %519 = vrot.lane.b32.xlu1 %v517_v60, %s1147_s8 }
 0x81b   : > { %v618_v17 = vpop.permute.xlu1 %617 }
 0x81c   : > { %v620_v18 = vadd.f32 %v618_v17, %v610_v16 }
 0x81e   : > { %1003 = vtanh.f32 %v620_v18  ;;  %721 = vrot.lane.b32.xlu1 %v620_v18, %s1148_s9 }
 0x81f   : > { %v520_v22 = vpop.permute.xlu1 %519 }
 0x820   : > { %523 = vst.msk [vmem:[#allocation3] sm:$0x1] %vm522_vm5, %v520_v22 }
 0x828   : > { %v1004_v26 = vpop.eup %1003 }
 0x829   : > { %623 = vrot.lane.b32.xlu0 %v1004_v26, %s1143_s26 }
 0x890   : > { %v722_v35 = vpop.permute.xlu1 %721 }
 0x89b   : > { %v624_v27 = vpop.permute.xlu0 %623 }
 0x89c   : > { %v626_v28 = vmul.f32 %v1002_v9, %v624_v27 }
 0x89e   : > { %628 = vst.msk [vmem:[#allocation3] sm:$0x1] %vm627_vm6, %v626_v28  ;;  %717 = vrot.lane.b32.xlu0 %v626_v28, %s1149_s10 }
 0x8a2   : > { %712 = vrot.lane.b32.xlu0 %v626_v28, %s1145_s6 }
 0x8a5   : > { %v636_v29 = vld [vmem:[#allocation3] sm:$0x1] }
 0x8a6   : > { %886 = vmatmul.mubr.msk.f32.vlgmr.msra.gmra.mrb[2].mxu0 %vm637_vm7, %v636_v29 }
 0x910   : > { %v718_v7 = vpop.permute.xlu0 %717 }
 0x914   : > { %v713_v30 = vpop.permute.xlu0 %712 }
 0x915   : > { %715 = vst.msk [vmem:[#allocation2] sm:$0x1] %vm403_vm4, %v713_v30 }
 0x916   : > { %716 = vst.msk [vmem:[#allocation2] sm:$0x1] %vm522_vm5, %v620_v18 }
 0x979   : > { %v707_v32 = vpop.f32.mrb[2].mxu0 }
 0x97a   : > { %v708_v33 = vadd.f32 %v707_v32, %v635_v31  ;;  %v887_v34 = vpop.f32.mrb[3].mxu0 }
 0x97c   : > { %v725_v36 = vsel %vm724_vm8, %v708_v33, %v718_v7 }
 0x97d   : > { %v727_v37 = vsel %vm726_vm9, %v725_v36, %v722_v35 }
 0x97e   : > { %v729_v38 = vsel %vm728_vm10, %v727_v37, 0.0 }
 0x97f   : > { %730 = vst [vmem:[%s196_s20] sm:$0x1] %v729_v38 }
 0x980   : > { %1076 = shalt.err (!%p1073_p10)
}
 0x981   : > { %s1077_s23 = scalar_lea.hbm %s1372_s22, 16  ;;  %s1081_s4 = scalar_lea.hbm %s1420_s3, 128 }
 0x982   : > { %p1078_p8 = scmp.ne.s32.totalorder %s1372_s22, %s1077_s23  ;;  %p1082_p2 = scmp.lt.u32.totalorder %s1372_s22, %s1420_s3 }
 0x983   : > { %p1083_p11 = scmp.lt.u32.totalorder %s1081_s4, %s1077_s23  ;;  %p1085_p4 = scmp.lt.u32.totalorder %s1077_s23, %s1372_s22 }
 0x984   : > { %p1079_p5 = pnand %p1078_p8, %p1255_p12 }
 0x985   : > { %p1084_p1 = por %p1083_p11, %p1082_p2 }
 0x986   : > { %p1080_p0 = pneg %p1079_p5 }
 0x987   : > { %p1086_p6 = por %p1085_p4, %p1084_p1 }
 0x989   : > { %p1087_p9 = pnand %p1086_p6, %p1080_p0 }
 0x98b   : > { %1090 = shalt.err (!%p1087_p9)
}
 0x98c   : > { %912 = dma.vmem_to_hbm [thread:$0]  (%p1255_p12), %s1374_s27, 16, %s1372_s22, %s732_s16  }
 0x98d PF: > { %p929_p13 = scmp.ge.s32.totalorder %s1133_s15, 2  ;;  %s756_s8 = sand.u32 1, %s1121_s12  }
 0x98e   : > { %p1436_p3 = scmp.ne.s32.totalorder %s1425_s19, 0  ;;  %s757_s9 = scalar_lea.sflag [#allocation6], %s756_s8 }
 0x990   : > { %p923_p7 = pnand %p929_p13, %p1436_p3 }
 0x992   : > { %1116 = dma.done.wait (!%p923_p7), %s757_s9, 16  }
 0x993   : > { %1118 = vsyncadd (!%p923_p7), %s757_s9, 4294967280  ;;  %p17_p10 = scmp.ge.s32.totalorder %s1225_s24, 10   ;;  %s1437_s12 = smov %s1125_s13 }
 0x994   : > { %s1438_s13 = smov %s1129_s14  ;;  %s1439_s14 = smov %s1251_s17 }
 0x995   : > { %s1440_s15 = smov %s1225_s24  ;;  %19 = sbr.rel (!%p17_p10) target bundleno = 6 (0x6), region = 86 }
 0x99c   :  { %761 = vsyncpa [#allocation5], 1 }
 0x99d   :  { %763 = vsyncpa [#allocation5 + $0x1], 1 }
 0x99e   :  { %764 = vsyncpa [#allocation8], 1 }
 0x99f   :  { %765 = vsyncpa [#allocation6], 1 }
 0x9a0   :  { %767 = vsyncpa [#allocation6 + $0x1], 1 }

</bundles_post_ra>
